<compile_context>
chip_gen: v6e
topology: v6e:2x2x1
jax: 0.10.0
libtpu: 0.0.40
codegen_flags: <defaults>
</compile_context>

<pallas_src>
import jax
import jax.numpy as jnp
from jax.experimental import pallas as pl
from jax.experimental.pallas import tpu as pltpu

HIDDEN = 64


def critic_kernel(x_ref, w1_ref, b1_ref, w2_ref, b2_ref, out_ref):
    # Layer 1 on the MXU, contracting over the state dim of both operands so
    # the result is feature-major: (64, S) x (tile_b, S)^T -> (64, tile_b).
    h = jax.lax.dot_general(
        w1_ref[...], x_ref[...],
        dimension_numbers=(((1,), (1,)), ((), ())),
        preferred_element_type=jnp.float32,
    )
    h = jnp.maximum(h + b1_ref[...], 0.0)          # bias + ReLU in f32 (VPU)
    # Layer 2 on the MXU: (1, 64) @ (64, tile_b) -> (1, tile_b), lane-dense.
    v = jnp.dot(w2_ref[...], h, preferred_element_type=jnp.float32)
    out_ref[...] = (v + b2_ref[...]).astype(out_ref.dtype)


def _round_up(n, m):
    return ((n + m - 1) // m) * m


def _choose_tile_b(batch, state_size, itemsize,
                   target_bytes=1 << 20, max_tile=32768):
    """Batch-tile width: ~1 MiB of streamed x per grid step, lane-aligned."""
    t = _round_up(max(1, target_bytes // max(1, state_size * itemsize)), 128)
    t = min(t, max_tile)
    # Do not build tiles (much) wider than the batch itself.
    t = min(t, _round_up(batch, 128))
    # Keep >= 2 grid steps when there is enough work so v7x megacore can split
    # the "parallel" batch axis across both TensorCores.
    if batch > 256:
        t = min(t, _round_up(pl.cdiv(batch, 2), 128))
    return max(t, 128)


def critic_forward(state, params, *, input_dtype=jnp.float32, tile_b=None,
                   vmem_limit_bytes=32 * 1024 * 1024):
    """state: (B, state_size) or (state_size,) -> (B, 1) float32 (or (1,))."""
    w1, b1, w2, b2 = params          # PyTorch layout: (64,S), (64,), (1,64), (1,)
    squeeze = state.ndim == 1
    x = state[None, :] if squeeze else state
    B, S = x.shape
    hidden = w1.shape[0]

    itemsize = jnp.dtype(input_dtype).itemsize
    if tile_b is None:
        tile_b = _choose_tile_b(B, S, itemsize)
    num_tiles = pl.cdiv(B, tile_b)
    b_pad = num_tiles * tile_b

    x_in = x.astype(input_dtype)
    if b_pad != B:
        # Ragged tail only: pad batch rows up to a whole number of tiles.  The
        # padded output columns are sliced off below; when B divides tile_b no
        # extra HBM pass over x happens at all.
        x_in = jnp.pad(x_in, ((0, b_pad - B), (0, 0)))

    w1_c = w1.astype(input_dtype)                      # (hidden, S) MXU operand
    b1_c = b1.reshape(hidden, 1).astype(jnp.float32)   # sublane-varying bias
    b2_c = b2.reshape(1, 1).astype(jnp.float32)        # final scalar bias
    w2_c = w2.reshape(1, hidden).astype(jnp.float32)   # (1, 64) MXU lhs row

    out = pl.pallas_call(
        critic_kernel,
        out_shape=jax.ShapeDtypeStruct((1, b_pad), jnp.float32),
        grid_spec=pltpu.PrefetchScalarGridSpec(
            num_scalar_prefetch=0,
            grid=(num_tiles,),
            in_specs=[
                pl.BlockSpec((tile_b, S), lambda i: (i, 0)),   # streamed x (natural layout)
                pl.BlockSpec((hidden, S), lambda i: (0, 0)),   # resident W1
                pl.BlockSpec((hidden, 1), lambda i: (0, 0)),   # resident b1
                pl.BlockSpec((1, hidden), lambda i: (0, 0)),   # resident w2 row
                pl.BlockSpec((1, 1), lambda i: (0, 0)),        # resident b2
            ],
            out_specs=pl.BlockSpec((1, tile_b), lambda i: (0, i)),  # lane-dense out
        ),
        compiler_params=pltpu.CompilerParams(
            dimension_semantics=("parallel",),
            vmem_limit_bytes=vmem_limit_bytes,
        ),
    )(x_in, w1_c, b1_c, w2_c, b2_c)

    value = out[0, :B].reshape(B, 1)
    return value.reshape(1) if squeeze else value


def init_params(key, state_size, hidden=HIDDEN):
    """Deterministic init mirroring PyTorch nn.Linear defaults (PyTorch layout)."""
    k1, k2, k3, k4 = jax.random.split(key, 4)
    bound1 = 1.0 / jnp.sqrt(jnp.float32(state_size))
    bound2 = 1.0 / jnp.sqrt(jnp.float32(hidden))
    w1 = jax.random.uniform(k1, (hidden, state_size), jnp.float32, -bound1, bound1)
    b1 = jax.random.uniform(k2, (hidden,), jnp.float32, -bound1, bound1)
    w2 = jax.random.uniform(k3, (1, hidden), jnp.float32, -bound2, bound2)
    b2 = jax.random.uniform(k4, (1,), jnp.float32, -bound2, bound2)
    return w1, b1, w2, b2


def critic_reference(state, params, cast_dtype=None):
    """Plain-JAX reference (same math as the PyTorch module), f32-accurate dots."""
    w1, b1, w2, b2 = params
    x = state[None, :] if state.ndim == 1 else state
    if cast_dtype is not None:
        x = x.astype(cast_dtype).astype(jnp.float32)
        w1 = w1.astype(cast_dtype).astype(jnp.float32)
    h = jnp.maximum(
        jnp.matmul(x, w1.T, precision=jax.lax.Precision.HIGHEST) + b1[None, :], 0.0)
    v = jnp.matmul(h, w2.T, precision=jax.lax.Precision.HIGHEST) + b2[None, :]
    return v.reshape(1) if state.ndim == 1 else v


if __name__ == "__main__":
    state_size = 8   # matches `state = torch.rand(8)` in the reference script

    key = jax.random.PRNGKey(0)
    k_state, k_params, k_big = jax.random.split(key, 3)
    params = init_params(k_params, state_size)

    # Tolerances are deliberately generous to absorb MXU f32 precision-mode
    # differences across TPU generations; structural errors are O(0.1-1).

    # Small batch (matches the PyTorch usage scale): single grid step.
    state = jax.random.uniform(k_state, (2, state_size), jnp.float32)
    value = jax.block_until_ready(critic_forward(state, params))
    ref = critic_reference(state, params)
    assert value.shape == (2, 1)
    assert jnp.allclose(value, ref, atol=1e-2), "f32 small-batch mismatch"

    # Single 1-D state, like `Critic()(torch.rand(8))` in the original script.
    single = jax.block_until_ready(critic_forward(state[0], params))
    assert single.shape == (1,)
    assert jnp.allclose(single, value[0], atol=1e-5), "1-D path mismatch"

    # Multi-tile path: 2 grid steps + ragged batch tail.
    big = jax.random.uniform(k_big, (300, state_size), jnp.float32)
    value_big = jax.block_until_ready(critic_forward(big, params))
    ref_big = critic_reference(big, params)
    assert value_big.shape == (300, 1)
    assert jnp.allclose(value_big, ref_big, atol=1e-2), "multi-tile mismatch"

    # bf16 MXU-operand streaming (f32 accumulation / elementwise), checked
    # against a reference computed on the same bf16-rounded operands.
    value_bf16 = jax.block_until_ready(
        critic_forward(big, params, input_dtype=jnp.bfloat16))
    ref_bf16 = critic_reference(big, params, cast_dtype=jnp.bfloat16)
    assert jnp.allclose(value_bf16, ref_bf16, atol=2e-2), "bf16 path mismatch"

    print("KERNEL_OK")
</pallas_src>

<mosaic_0001>
module attributes {stable_mosaic.version = 11 : i64} {
  func.func @critic_kernel(%arg0: i32, %arg1: memref<128x8xf32, #tpu.memory_space<vmem>>, %arg2: memref<64x8xf32, #tpu.memory_space<vmem>>, %arg3: memref<64x1xf32, #tpu.memory_space<vmem>>, %arg4: memref<1x64xf32, #tpu.memory_space<vmem>>, %arg5: memref<1x1xf32, #tpu.memory_space<vmem>>, %arg6: memref<1x128xf32, #tpu.memory_space<vmem>>) attributes {dimension_semantics = [#tpu.dimension_semantics<parallel>], iteration_bounds = array<i64: 1>, scalar_prefetch = 0 : i64, scratch_operands = 0 : i64, tpu.core_type = #tpu.core_type<tc>, window_params = [{transform_indices = @transform_0, window_bounds = array<i64: 128, 8>}, {pipeline_mode = #tpu.pipeline_mode<synchronous>, transform_indices = @transform_1, window_bounds = array<i64: 64, 8>}, {pipeline_mode = #tpu.pipeline_mode<synchronous>, transform_indices = @transform_2, window_bounds = array<i64: 64, 1>}, {pipeline_mode = #tpu.pipeline_mode<synchronous>, transform_indices = @transform_3, window_bounds = array<i64: 1, 64>}, {pipeline_mode = #tpu.pipeline_mode<synchronous>, transform_indices = @transform_4, window_bounds = array<i64: 1, 1>}, {transform_indices = @transform_5, window_bounds = array<i64: 1, 128>}]} {
    %c0 = arith.constant 0 : index
    %c0_0 = arith.constant 0 : index
    %0 = vector.load %arg2[%c0, %c0_0] : memref<64x8xf32, #tpu.memory_space<vmem>>, vector<64x8xf32>
    %c0_1 = arith.constant 0 : index
    %c0_2 = arith.constant 0 : index
    %1 = vector.load %arg1[%c0_1, %c0_2] : memref<128x8xf32, #tpu.memory_space<vmem>>, vector<128x8xf32>
    %cst = arith.constant dense<0.000000e+00> : vector<64x128xf32>
    %2 = tpu.matmul %0, %1, %cst {dimension_numbers = #tpu.dot_dimension_numbers<[1], [1], [0], [0], [0, 0, 1, 0], [], []>} : vector<64x8xf32>, vector<128x8xf32>, vector<64x128xf32> -> vector<64x128xf32>
    %c0_3 = arith.constant 0 : index
    %c0_4 = arith.constant 0 : index
    %3 = vector.load %arg3[%c0_3, %c0_4] : memref<64x1xf32, #tpu.memory_space<vmem>>, vector<64x1xf32>
    %4 = vector.broadcast %3 : vector<64x1xf32> to vector<64x128xf32>
    %5 = arith.addf %2, %4 : vector<64x128xf32>
    %cst_5 = arith.constant 0.000000e+00 : f32
    %6 = vector.broadcast %cst_5 : f32 to vector<64x128xf32>
    %7 = arith.maximumf %5, %6 : vector<64x128xf32>
    %c0_6 = arith.constant 0 : index
    %c0_7 = arith.constant 0 : index
    %8 = vector.load %arg4[%c0_6, %c0_7] : memref<1x64xf32, #tpu.memory_space<vmem>>, vector<1x64xf32>
    %cst_8 = arith.constant dense<0.000000e+00> : vector<1x128xf32>
    %9 = tpu.matmul %8, %7, %cst_8 {dimension_numbers = #tpu.dot_dimension_numbers<[1], [0], [0], [1], [0, 0, 1, 1], [], []>} : vector<1x64xf32>, vector<64x128xf32>, vector<1x128xf32> -> vector<1x128xf32>
    %c0_9 = arith.constant 0 : index
    %c0_10 = arith.constant 0 : index
    %10 = vector.load %arg5[%c0_9, %c0_10] : memref<1x1xf32, #tpu.memory_space<vmem>>, vector<1x1xf32>
    %11 = vector.broadcast %10 : vector<1x1xf32> to vector<1x128xf32>
    %12 = arith.addf %9, %11 : vector<1x128xf32>
    %c0_11 = arith.constant 0 : index
    %c0_12 = arith.constant 0 : index
    %13 = vector.load %arg6[%c0_11, %c0_12] : memref<1x128xf32, #tpu.memory_space<vmem>>, vector<1x128xf32>
    tpu.vector_store %arg6[%c0_11, %c0_12], %12 {strides = array<i32>} : memref<1x128xf32, #tpu.memory_space<vmem>>, vector<1x128xf32>,
    return
  }
  func.func @transform_0(%arg0: i32) -> (i32, i32) {
    %c0_i32 = arith.constant 0 : i32
    %c0_i32_0 = arith.constant 0 : i32
    return %arg0, %c0_i32 : i32, i32
  }
  func.func @transform_1(%arg0: i32) -> (i32, i32) {
    %c0_i32 = arith.constant 0 : i32
    %c0_i32_0 = arith.constant 0 : i32
    %c0_i32_1 = arith.constant 0 : i32
    return %c0_i32, %c0_i32_0 : i32, i32
  }
  func.func @transform_2(%arg0: i32) -> (i32, i32) {
    %c0_i32 = arith.constant 0 : i32
    %c0_i32_0 = arith.constant 0 : i32
    %c0_i32_1 = arith.constant 0 : i32
    return %c0_i32, %c0_i32_0 : i32, i32
  }
  func.func @transform_3(%arg0: i32) -> (i32, i32) {
    %c0_i32 = arith.constant 0 : i32
    %c0_i32_0 = arith.constant 0 : i32
    %c0_i32_1 = arith.constant 0 : i32
    return %c0_i32, %c0_i32_0 : i32, i32
  }
  func.func @transform_4(%arg0: i32) -> (i32, i32) {
    %c0_i32 = arith.constant 0 : i32
    %c0_i32_0 = arith.constant 0 : i32
    %c0_i32_1 = arith.constant 0 : i32
    return %c0_i32, %c0_i32_0 : i32, i32
  }
  func.func @transform_5(%arg0: i32) -> (i32, i32) {
    %c0_i32 = arith.constant 0 : i32
    %c0_i32_0 = arith.constant 0 : i32
    return %c0_i32, %arg0 : i32, i32
  }
}

</mosaic_0001>

<bundles_post_ra>
// kernel: tpu_custom_call.1
= control target key start
LH: loop header
LB: loop body
LE: loop exit
PB: predicated region body
PF: predicated region fallthrough
CT: control target
= control target key end

     0   :  { %s709_s0 = inlined_call_operand.vmem [shape: f32[128,8], index: 0, kind: input, shape index: {}]   ;;  %s710_s1 = inlined_call_operand.vmem [shape: f32[64,8], index: 1, kind: input, shape index: {}]   ;;  %s711_s2 = inlined_call_operand.vmem [shape: f32[64,1], index: 2, kind: input, shape index: {}]   ;;  %s712_s3 = inlined_call_operand.vmem [shape: f32[1,64], index: 3, kind: input, shape index: {}]   ;;  %s713_s4 = inlined_call_operand.<no memory space> [shape: f32[1,1], index: 4, kind: input, shape index: {}]   ;;  %s714_s5 = inlined_call_operand.hbm [shape: f32[1,128], index: 5, kind: output, shape index: {}]  }
   0x1   :  { %v10_v0 = vstv %s713_s4 }
   0x2   :  { %11 = vst [vmem:[#allocation2] sm:$0x1] %v10_v0 }
   0x3   :  { %v46_v1 = vld [vmem:[%s709_s0 + $0x78] sm:$0xff]  ;;  %vm95_vm0 = vcmask 64512   ;;  %v45_v2 = vld [vmem:[%s709_s0 + $0x70] sm:$0xff]  ;;  %v530_v3 = vmov 0   ;;  %v44_v4 = vld [vmem:[%s709_s0 + $0x68] sm:$0xff] }
   0x4   :  { %439 = vmatprep.subr.msk.mxu0 %vm95_vm0, %v46_v1  ;;  %506 = vset.pattern.permute.xlu0 %v530_v3  ;;  %v23_v5 = vld [vmem:[%s710_s1] sm:$0xff]  ;;  %v54_v7 = vld [vmem:[%s711_s2 + $0x38] sm:$0xff]  ;;  %v52_v8 = vld [vmem:[%s711_s2 + $0x28] sm:$0xff] }
   0x5   :  { %440 = vmatpush3.xpose.msk.msra.mxu0 %vm95_vm0, %v46_v1  ;;  %507 = vset.pattern.permute.xlu1 %v530_v3  ;;  %v43_v6 = vld [vmem:[%s709_s0 + $0x60] sm:$0xff]  ;;  %v53_v9 = vld [vmem:[%s711_s2 + $0x30] sm:$0xff] }
   0x6   :  { %441 = vmatprep.subr.msk.mxu0 %vm95_vm0, %v45_v2  ;;  %471 = vmatprep.mubr.msk.f32.mxu0 %vm95_vm0, %v23_v5  ;;  %v51_v10 = vld [vmem:[%s711_s2 + $0x20] sm:$0xff] }
   0x7   :  { %92 = vperm.xlu0 %506, %v54_v7   ;;  %82 = vperm.xlu1 %507, %v52_v8  }
   0x9   :  { %442 = vmatpush3.xpose.msk.msra.mxu0 %vm95_vm0, %v45_v2 }
   0xa   :  { %443 = vmatprep.subr.msk.mxu0 %vm95_vm0, %v44_v4 }
   0xd   :  { %444 = vmatpush3.xpose.msk.msra.mxu0 %vm95_vm0, %v44_v4 }
   0xe   :  { %445 = vmatprep.subr.msk.mxu0 %vm95_vm0, %v43_v6 }
   0xf   :  { %12 = vsyncpa [#allocation4], 0  ;;  %v42_v11 = vld [vmem:[%s709_s0 + $0x58] sm:$0xff]  ;;  %87 = vperm.xlu0 %506, %v53_v9   ;;  %77 = vperm.xlu1 %507, %v51_v10   ;;  %v49_v13 = vld [vmem:[%s711_s2 + $0x10] sm:$0xff]  ;;  %v531_v35 = vmov 0.0   ;;  %vm532_vm1 = vmmov 0   ;;  %v288_v5 = vlaneseq }
  0x10   :  { %v50_v12 = vld [vmem:[%s711_s2 + $0x18] sm:$0xff]  ;;  %v41_v14 = vld [vmem:[%s709_s0 + $0x50] sm:$0xff]  ;;  %v48_v15 = vld [vmem:[%s711_s2 + $0x8] sm:$0xff]  ;;  %483 = vmatprep.subr.mxu1 %v531_v35  ;;  %499 = vmatprep.mubr.msk.f32.mxu1 %vm532_vm1, %v531_v35  ;;  %vm292_vm2 = vcmask 523264   ;;  %s533_s29 = smov [#allocation3]  }
  0x11   :  { %446 = vmatpush3.xpose.msk.msra.mxu0 %vm95_vm0, %v43_v6  ;;  %v47_v16 = vld [vmem:[%s711_s2] sm:$0xff]  ;;  %v40_v17 = vld [vmem:[%s709_s0 + $0x48] sm:$0xff]  ;;  %v38_v20 = vld [vmem:[%s709_s0 + $0x38] sm:$0xff]  ;;  %v289_v6 = vshrl.u32 %v288_v5, 7  ;;  %s373_s30 = sshll.u32 %s533_s29, 4  ;;  %s374_s30 = int_to_ptr.vmem [resolvable:$true] %s373_s30 }
  0x12   :  { %447 = vmatprep.subr.msk.mxu0 %vm95_vm0, %v42_v11  ;;  %v282_v18 = vld [vmem:[#allocation2] sm:$0x1]  ;;  %v37_v21 = vld [vmem:[%s709_s0 + $0x30] sm:$0xff]  ;;  %v36_v22 = vld [vmem:[%s709_s0 + $0x28] sm:$0xff]  ;;  %s508_s6 = scalar_lea.vmem %s374_s30, 16  ;;  %s512_s7 = scalar_lea.vmem %s374_s30, 32 }
  0x13   :  { %72 = vperm.xlu0 %506, %v50_v12   ;;  %67 = vperm.xlu1 %507, %v49_v13   ;;  %v39_v19 = vld [vmem:[%s709_s0 + $0x40] sm:$0xff]  ;;  %v34_v24 = vld [vmem:[%s709_s0 + $0x18] sm:$0xff]  ;;  %v33_v25 = vld [vmem:[%s709_s0 + $0x10] sm:$0xff]  ;;  %v290_v7 = vsub.s32 0, %v289_v6  ;;  %p509_p0 = scmp.ne.s32.totalorder %s374_s30, %s508_s6  ;;  %p513_p1 = scmp.lt.s32.totalorder %s374_s30, %s374_s30 }
  0x14   :  { %v35_v23 = vld [vmem:[%s709_s0 + $0x20] sm:$0xff]  ;;  %v32_v26 = vld [vmem:[%s709_s0 + $0x8] sm:$0xff]  ;;  %v25_v29 = vld [vmem:[%s710_s1 + $0x10] sm:$0xff]  ;;  %p514_p2 = scmp.lt.s32.totalorder %s512_s7, %s508_s6 }
  0x15   :  { %448 = vmatpush3.xpose.msk.msra.mxu0 %vm95_vm0, %v42_v11  ;;  %v31_v27 = vld [vmem:[%s709_s0] sm:$0xff]  ;;  %v24_v28 = vld [vmem:[%s710_s1 + $0x8] sm:$0xff]  ;;  %v26_v30 = vld [vmem:[%s710_s1 + $0x18] sm:$0xff] }
  0x16   :  { %449 = vmatprep.subr.msk.mxu0 %vm95_vm0, %v41_v14  ;;  %v27_v31 = vld [vmem:[%s710_s1 + $0x20] sm:$0xff]  ;;  %v28_v32 = vld [vmem:[%s710_s1 + $0x28] sm:$0xff]  ;;  %v29_v33 = vld [vmem:[%s710_s1 + $0x30] sm:$0xff]  ;;  %p515_p3 = por %p514_p2, %p513_p1 }
  0x17   :  { %62 = vperm.xlu0 %506, %v48_v15   ;;  %57 = vperm.xlu1 %507, %v47_v16   ;;  %v30_v34 = vld [vmem:[%s710_s1 + $0x38] sm:$0xff]  ;;  %v281_v4 = vld [vmem:[%s712_s3] sm:$0x1] }
  0x18   :  { %p516_p4 = pnand %p515_p3, %p509_p0 }
  0x19   :  { %450 = vmatpush3.xpose.msk.msra.mxu0 %vm95_vm0, %v41_v14 }
  0x1a   :  { %451 = vmatprep.subr.msk.mxu0 %vm95_vm0, %v40_v17 }
  0x1b   :  { %285 = vperm.xlu0 %506, %v282_v18  }
  0x1d   :  { %452 = vmatpush3.xpose.msk.msra.mxu0 %vm95_vm0, %v40_v17 }
  0x1e   :  { %453 = vmatprep.subr.msk.mxu0 %vm95_vm0, %v39_v19 }
  0x21   :  { %454 = vmatpush3.xpose.msk.msra.mxu0 %vm95_vm0, %v39_v19 }
  0x22   :  { %455 = vmatprep.subr.msk.mxu0 %vm95_vm0, %v38_v20 }
  0x25   :  { %456 = vmatpush3.xpose.msk.msra.mxu0 %vm95_vm0, %v38_v20 }
  0x26   :  { %457 = vmatprep.subr.msk.mxu0 %vm95_vm0, %v37_v21 }
  0x29   :  { %458 = vmatpush3.xpose.msk.msra.mxu0 %vm95_vm0, %v37_v21 }
  0x2a   :  { %459 = vmatprep.subr.msk.mxu0 %vm95_vm0, %v36_v22 }
  0x2d   :  { %460 = vmatpush3.xpose.msk.msra.mxu0 %vm95_vm0, %v36_v22 }
  0x2e   :  { %461 = vmatprep.subr.msk.mxu0 %vm95_vm0, %v35_v23 }
  0x31   :  { %462 = vmatpush3.xpose.msk.msra.mxu0 %vm95_vm0, %v35_v23 }
  0x32   :  { %463 = vmatprep.subr.msk.mxu0 %vm95_vm0, %v34_v24 }
  0x35   :  { %464 = vmatpush3.xpose.msk.msra.mxu0 %vm95_vm0, %v34_v24 }
  0x36   :  { %465 = vmatprep.subr.msk.mxu0 %vm95_vm0, %v33_v25 }
  0x39   :  { %466 = vmatpush3.xpose.msk.msra.mxu0 %vm95_vm0, %v33_v25 }
  0x3a   :  { %467 = vmatprep.subr.msk.mxu0 %vm95_vm0, %v32_v26 }
  0x3d   :  { %468 = vmatpush3.xpose.msk.msra.mxu0 %vm95_vm0, %v32_v26 }
  0x3e   :  { %469 = vmatprep.subr.msk.mxu0 %vm95_vm0, %v31_v27 }
  0x41   :  { %470 = vmatpush3.xpose.msk.msra.mxu0 %vm95_vm0, %v31_v27 }
  0x44   :  { %472 = vmatmul.mubr.msk.f32.vlgmr.msra.gmra.mxu0 %vm95_vm0, %v24_v28 }
  0x45   :  { %474 = vmatprep.mubr.msk.f32.mxu0 %vm95_vm0, %v25_v29 }
  0x48   :  { %475 = vmatmul.mubr.msk.f32.gmra.mxu0 %vm95_vm0, %v26_v30 }
  0x49   :  { %477 = vmatprep.mubr.msk.f32.mxu0 %vm95_vm0, %v27_v31 }
  0x4c   :  { %478 = vmatmul.mubr.msk.f32.gmra.mxu0 %vm95_vm0, %v28_v32 }
  0x4d   :  { %480 = vmatprep.mubr.msk.f32.mxu0 %vm95_vm0, %v29_v33 }
  0x50   :  { %481 = vmatmul.mubr.msk.f32.gmra.mxu0 %vm95_vm0, %v30_v34 }
  0x82   :  { %v93_v37 = vpop.permute.xlu0 %92  ;;  %v83_v39 = vpop.permute.xlu1 %82 }
  0x8a   :  { %v88_v42 = vpop.permute.xlu0 %87  ;;  %v78_v44 = vpop.permute.xlu1 %77 }
  0x8e   :  { %v73_v48 = vpop.permute.xlu0 %72  ;;  %v68_v53 = vpop.permute.xlu1 %67 }
  0x92   :  { %v63_v58 = vpop.permute.xlu0 %62  ;;  %v58_v61 = vpop.permute.xlu1 %57 }
  0x96   :  { %v286_v8 = vpop.permute.xlu0 %285 }
  0x97   :  { %v291_v9 = vrot.slane %v286_v8, %v290_v7 }
 0x104   :  { %v473_v36 = vpop.f32.mrf.mxu0 }
 0x105   :  { %v240_v62 = vadd.f32 %v473_v36, %v63_v58 }
 0x106   :  { %v234_v38 = vpop.f32.mrf.mxu0 }
 0x107   :  { %v235_v0 = vadd.f32 %v234_v38, %v58_v61  ;;  %v274_v2 = vmax.f32 %v240_v62, 0.0 }
 0x108   :  { %v476_v40 = vpop.f32.mrf.mxu0 }
 0x109   :  { %v250_v56 = vadd.f32 %v476_v40, %v73_v48  ;;  %v273_v3 = vmax.f32 %v235_v0, 0.0 }
 0x10a   :  { %v244_v41 = vpop.f32.mrf.mxu0 }
 0x10b   :  { %v245_v59 = vadd.f32 %v244_v41, %v68_v53  ;;  %v276_v63 = vmax.f32 %v250_v56, 0.0 }
 0x10c   :  { %v479_v43 = vpop.f32.mrf.mxu0 }
 0x10d   :  { %v260_v50 = vadd.f32 %v479_v43, %v83_v39  ;;  %v275_v1 = vmax.f32 %v245_v59, 0.0 }
 0x10e   :  { %v254_v45 = vpop.f32.mrf.mxu0 }
 0x10f   :  { %v255_v54 = vadd.f32 %v254_v45, %v78_v44  ;;  %v278_v57 = vmax.f32 %v260_v50, 0.0 }
 0x110   :  { %v482_v46 = vpop.f32.mrf.mxu0 }
 0x111   :  { %v270_v47 = vadd.f32 %v482_v46, %v93_v37  ;;  %v277_v60 = vmax.f32 %v255_v54, 0.0 }
 0x112   :  { %v264_v49 = vpop.f32.mrf.mxu0 }
 0x113   :  { %v280_v51 = vmax.f32 %v270_v47, 0.0  ;;  %v265_v52 = vadd.f32 %v264_v49, %v88_v42 }
 0x115   :  { %v279_v55 = vmax.f32 %v265_v52, 0.0  ;;  %484 = vmatpush3.msra.mxu1 %v280_v51 }
 0x116   :  { %485 = vmatprep.subr.mxu1 %v531_v35 }
 0x117   :  { %486 = vmatpush3.msra.mxu1 %v279_v55 }
 0x118   :  { %487 = vmatprep.subr.mxu1 %v531_v35 }
 0x119   :  { %488 = vmatpush3.msra.mxu1 %v278_v57 }
 0x11a   :  { %489 = vmatprep.subr.mxu1 %v531_v35 }
 0x11b   :  { %490 = vmatpush3.msra.mxu1 %v277_v60 }
 0x11c   :  { %491 = vmatprep.subr.mxu1 %v531_v35 }
 0x11d   :  { %492 = vmatpush3.msra.mxu1 %v276_v63 }
 0x11e   :  { %493 = vmatprep.subr.mxu1 %v531_v35 }
 0x11f   :  { %494 = vmatpush3.msra.mxu1 %v275_v1 }
 0x120   :  { %495 = vmatprep.subr.mxu1 %v531_v35 }
 0x121   :  { %496 = vmatpush3.msra.mxu1 %v274_v2 }
 0x122   :  { %497 = vmatprep.subr.mxu1 %v531_v35 }
 0x123   :  { %498 = vmatpush3.msra.mxu1 %v273_v3 }
 0x124   :  { %500 = vmatmul.mubr.msk.f32.vlgmr.msra.gmra.mxu1 %vm292_vm2, %v281_v4 }
 0x1e4   :  { %v362_v10 = vpop.f32.mrf.mxu1 }
 0x1e5   :  { %v363_v11 = vadd.f32 %v362_v10, %v291_v9 }
 0x1e6   :  { %v501_v12 = vpop.f32.mrf.mxu1 }
 0x1e7   :  { %366 = vst [vmem:[#allocation3] sm:$0x1] %v363_v11 }
 0x1e8   :  { %519 = shalt.err (!%p516_p4)
}
 0x1e9   :  { %376 = dma.vmem_to_hbm [thread:$0]  %s374_s30, 16, %s714_s5, [#allocation4]  }
 0x1ea   :  { %528 = dma.done.wait [#allocation4], 16  }
 0x1eb   :  { %529 = vsyncadd [#allocation4], 4294967280 }
 0x1ec   :  { %380 = vsyncpa [#allocation4], 1 }

</bundles_post_ra>
